<compile_context>
chip_gen: v6e
topology: v6e:2x2x1
jax: 0.10.0
libtpu: 0.0.40
codegen_flags: <defaults>
</compile_context>

<pallas_src>
import jax
import jax.numpy as jnp
from jax.experimental import pallas as pl
from jax.experimental.pallas import tpu as pltpu

_LANE = 128


def _mlp_kernel(xT_ref, w1_ref, b1_ref, w2_ref, b2_ref, w3_ref, b3_ref, oT_ref):
    """All operands are transposed: batch on lanes, features on sublanes."""
    mm_dtype = w1_ref.dtype
    # Layer 1: (f1, f0) @ (f0, bt) -> (f1, bt), + bias column, Tanh (f32 math).
    h = jnp.dot(w1_ref[...], xT_ref[...], preferred_element_type=jnp.float32)
    h = jnp.tanh(h + b1_ref[...])
    # Layer 2: (f2, f1) @ (f1, bt) -> (f2, bt), + bias, ReLU.
    h = jnp.dot(w2_ref[...], h.astype(mm_dtype), preferred_element_type=jnp.float32)
    h = jnp.maximum(h + b2_ref[...], 0.0)
    # Layer 3: (f3, f2) @ (f2, bt) -> (f3, bt), no activation (actfunc None).
    o = jnp.dot(w3_ref[...], h.astype(mm_dtype), preferred_element_type=jnp.float32)
    oT_ref[...] = (o + b3_ref[...]).astype(oT_ref.dtype)


def mlp_forward(x, params, *, batch_tile=1024, matmul_dtype=jnp.float32):
    """x: (B, nodes[0]) float32.  params: list of (W(out,in), b(out,)) per layer.

    batch_tile is the only B-scaling knob; it is clamped to the (128-padded)
    batch and kept a multiple of 128 so all lane-axis tiles are dense.
    matmul_dtype=jnp.bfloat16 is recommended on v6e/v7x when B is large.
    """
    (w1, b1), (w2, b2), (w3, b3) = params
    B, f0 = x.shape
    f1, f2, f3 = w1.shape[0], w2.shape[0], w3.shape[0]

    # --- wrapper-side layout plumbing (not compute) -------------------------
    # Pad batch up to a multiple of 128 lanes, pick a lane-multiple tile.
    b_pad = max(_LANE, ((B + _LANE - 1) // _LANE) * _LANE)
    bt = min(batch_tile, b_pad)
    bt = max(_LANE, (bt // _LANE) * _LANE)
    b_pad = ((b_pad + bt - 1) // bt) * bt
    grid = (b_pad // bt,)

    # x^T with zero-padded extra batch columns (sliced off after the call).
    xT = jnp.zeros((f0, b_pad), matmul_dtype).at[:, :B].set(
        x.T.astype(matmul_dtype))
    # Weights stay (out, in) so hT = W @ xT; biases become (f, 1) columns that
    # broadcast along lanes.  Bias/activation math is kept in f32.
    w1c, w2c, w3c = (w.astype(matmul_dtype) for w in (w1, w2, w3))
    b1c = b1.reshape(f1, 1).astype(jnp.float32)
    b2c = b2.reshape(f2, 1).astype(jnp.float32)
    b3c = b3.reshape(f3, 1).astype(jnp.float32)

    def batch_map(i):   # tile the lane (batch) axis only
        return (0, i)

    def rep_map(i):     # constant block index -> stays VMEM-resident
        return (0, 0)

    outT = pl.pallas_call(
        _mlp_kernel,
        out_shape=jax.ShapeDtypeStruct((f3, b_pad), jnp.float32),
        grid_spec=pltpu.PrefetchScalarGridSpec(
            num_scalar_prefetch=0,
            grid=grid,
            in_specs=[
                pl.BlockSpec((f0, bt), batch_map),   # x^T tile  (8, bt)
                pl.BlockSpec((f1, f0), rep_map),     # W1        (32, 8)
                pl.BlockSpec((f1, 1), rep_map),      # b1        (32, 1)
                pl.BlockSpec((f2, f1), rep_map),     # W2        (32, 32)
                pl.BlockSpec((f2, 1), rep_map),      # b2        (32, 1)
                pl.BlockSpec((f3, f2), rep_map),     # W3        (4, 32)
                pl.BlockSpec((f3, 1), rep_map),      # b3        (4, 1)
            ],
            out_specs=pl.BlockSpec((f3, bt), batch_map),  # o^T tile (4, bt) lane-dense
        ),
        compiler_params=pltpu.CompilerParams(
            dimension_semantics=("parallel",)),      # v7x: shards multi-step grids over 2 TCs
    )(xT, w1c, b1c, w2c, b2c, w3c, b3c)

    # Undo the layout plumbing: drop batch padding, transpose back to (B, f3).
    return outT[:, :B].T.astype(jnp.float32)


def init_linear(key, in_features, out_features):
    """Deterministic init matching nn.Linear defaults: U(-1/sqrt(in), 1/sqrt(in))."""
    kw, kb = jax.random.split(key)
    bound = 1.0 / jnp.sqrt(jnp.float32(in_features))
    w = jax.random.uniform(kw, (out_features, in_features), jnp.float32, -bound, bound)
    b = jax.random.uniform(kb, (out_features,), jnp.float32, -bound, bound)
    return w, b


def mlp_reference(x, params):
    (w1, b1), (w2, b2), (w3, b3) = params
    h = jnp.tanh(x @ w1.T + b1)
    h = jnp.maximum(h @ w2.T + b2, 0.0)
    return h @ w3.T + b3


if __name__ == "__main__":
    # hyperparam = {"layer": 4, "nodes": [8, 32, 32, 4], "actfunc": ["Tanh", "ReLU", None]}
    nodes = [8, 32, 32, 4]
    key = jax.random.PRNGKey(0)
    k_x, k_x2, k1, k2, k3 = jax.random.split(key, 5)

    params = [
        init_linear(k1, nodes[0], nodes[1]),
        init_linear(k2, nodes[1], nodes[2]),
        init_linear(k3, nodes[2], nodes[3]),
    ]

    # Small batch: collapses to a single 128-wide (padded) block, grid = (1,).
    B = 16
    x = jax.random.normal(k_x, (B, nodes[0]), jnp.float32)
    out = jax.block_until_ready(mlp_forward(x, params))
    ref = mlp_reference(x, params)
    assert out.shape == (B, nodes[3])
    assert jnp.allclose(out, ref, atol=1e-5, rtol=1e-5), "mismatch vs reference (B=16)"

    # Multi-step grid path (grid = (2,)) to exercise the pipelined batch tiling.
    B2 = 256
    x2 = jax.random.normal(k_x2, (B2, nodes[0]), jnp.float32)
    out2 = jax.block_until_ready(mlp_forward(x2, params, batch_tile=128))
    ref2 = mlp_reference(x2, params)
    assert out2.shape == (B2, nodes[3])
    assert jnp.allclose(out2, ref2, atol=1e-5, rtol=1e-5), "mismatch vs reference (B=256)"

    print("KERNEL_OK")
</pallas_src>

<mosaic_0001>
module attributes {stable_mosaic.version = 11 : i64} {
  func.func @_mlp_kernel(%arg0: i32, %arg1: memref<8x128xf32, #tpu.memory_space<vmem>>, %arg2: memref<32x8xf32, #tpu.memory_space<vmem>>, %arg3: memref<32x1xf32, #tpu.memory_space<vmem>>, %arg4: memref<32x32xf32, #tpu.memory_space<vmem>>, %arg5: memref<32x1xf32, #tpu.memory_space<vmem>>, %arg6: memref<4x32xf32, #tpu.memory_space<vmem>>, %arg7: memref<4x1xf32, #tpu.memory_space<vmem>>, %arg8: memref<4x128xf32, #tpu.memory_space<vmem>>) attributes {dimension_semantics = [#tpu.dimension_semantics<parallel>], iteration_bounds = array<i64: 1>, scalar_prefetch = 0 : i64, scratch_operands = 0 : i64, tpu.core_type = #tpu.core_type<tc>, window_params = [{transform_indices = @transform_0, window_bounds = array<i64: 8, 128>}, {pipeline_mode = #tpu.pipeline_mode<synchronous>, transform_indices = @transform_1, window_bounds = array<i64: 32, 8>}, {pipeline_mode = #tpu.pipeline_mode<synchronous>, transform_indices = @transform_2, window_bounds = array<i64: 32, 1>}, {pipeline_mode = #tpu.pipeline_mode<synchronous>, transform_indices = @transform_3, window_bounds = array<i64: 32, 32>}, {pipeline_mode = #tpu.pipeline_mode<synchronous>, transform_indices = @transform_4, window_bounds = array<i64: 32, 1>}, {pipeline_mode = #tpu.pipeline_mode<synchronous>, transform_indices = @transform_5, window_bounds = array<i64: 4, 32>}, {pipeline_mode = #tpu.pipeline_mode<synchronous>, transform_indices = @transform_6, window_bounds = array<i64: 4, 1>}, {transform_indices = @transform_7, window_bounds = array<i64: 4, 128>}]} {
    %c0 = arith.constant 0 : index
    %c0_0 = arith.constant 0 : index
    %0 = vector.load %arg2[%c0, %c0_0] : memref<32x8xf32, #tpu.memory_space<vmem>>, vector<32x8xf32>
    %c0_1 = arith.constant 0 : index
    %c0_2 = arith.constant 0 : index
    %1 = vector.load %arg1[%c0_1, %c0_2] : memref<8x128xf32, #tpu.memory_space<vmem>>, vector<8x128xf32>
    %cst = arith.constant dense<0.000000e+00> : vector<32x128xf32>
    %2 = tpu.matmul %0, %1, %cst {dimension_numbers = #tpu.dot_dimension_numbers<[1], [0], [0], [1], [0, 0, 1, 1], [], []>} : vector<32x8xf32>, vector<8x128xf32>, vector<32x128xf32> -> vector<32x128xf32>
    %c0_3 = arith.constant 0 : index
    %c0_4 = arith.constant 0 : index
    %3 = vector.load %arg3[%c0_3, %c0_4] : memref<32x1xf32, #tpu.memory_space<vmem>>, vector<32x1xf32>
    %4 = vector.broadcast %3 : vector<32x1xf32> to vector<32x128xf32>
    %5 = arith.addf %2, %4 : vector<32x128xf32>
    %6 = math.tanh %5 : vector<32x128xf32>
    %c0_5 = arith.constant 0 : index
    %c0_6 = arith.constant 0 : index
    %7 = vector.load %arg4[%c0_5, %c0_6] : memref<32x32xf32, #tpu.memory_space<vmem>>, vector<32x32xf32>
    %cst_7 = arith.constant dense<0.000000e+00> : vector<32x128xf32>
    %8 = tpu.matmul %7, %6, %cst_7 {dimension_numbers = #tpu.dot_dimension_numbers<[1], [0], [0], [1], [0, 0, 1, 1], [], []>} : vector<32x32xf32>, vector<32x128xf32>, vector<32x128xf32> -> vector<32x128xf32>
    %c0_8 = arith.constant 0 : index
    %c0_9 = arith.constant 0 : index
    %9 = vector.load %arg5[%c0_8, %c0_9] : memref<32x1xf32, #tpu.memory_space<vmem>>, vector<32x1xf32>
    %10 = vector.broadcast %9 : vector<32x1xf32> to vector<32x128xf32>
    %11 = arith.addf %8, %10 : vector<32x128xf32>
    %cst_10 = arith.constant 0.000000e+00 : f32
    %12 = vector.broadcast %cst_10 : f32 to vector<32x128xf32>
    %13 = arith.maximumf %11, %12 : vector<32x128xf32>
    %c0_11 = arith.constant 0 : index
    %c0_12 = arith.constant 0 : index
    %14 = vector.load %arg6[%c0_11, %c0_12] : memref<4x32xf32, #tpu.memory_space<vmem>>, vector<4x32xf32>
    %cst_13 = arith.constant dense<0.000000e+00> : vector<4x128xf32>
    %15 = tpu.matmul %14, %13, %cst_13 {dimension_numbers = #tpu.dot_dimension_numbers<[1], [0], [0], [1], [0, 0, 1, 1], [], []>} : vector<4x32xf32>, vector<32x128xf32>, vector<4x128xf32> -> vector<4x128xf32>
    %c0_14 = arith.constant 0 : index
    %c0_15 = arith.constant 0 : index
    %16 = vector.load %arg7[%c0_14, %c0_15] : memref<4x1xf32, #tpu.memory_space<vmem>>, vector<4x1xf32>
    %17 = vector.broadcast %16 : vector<4x1xf32> to vector<4x128xf32>
    %18 = arith.addf %15, %17 : vector<4x128xf32>
    %c0_16 = arith.constant 0 : index
    %c0_17 = arith.constant 0 : index
    %19 = vector.load %arg8[%c0_16, %c0_17] : memref<4x128xf32, #tpu.memory_space<vmem>>, vector<4x128xf32>
    tpu.vector_store %arg8[%c0_16, %c0_17], %18 {strides = array<i32>} : memref<4x128xf32, #tpu.memory_space<vmem>>, vector<4x128xf32>,
    return
  }
  func.func @transform_0(%arg0: i32) -> (i32, i32) {
    %c0_i32 = arith.constant 0 : i32
    %c0_i32_0 = arith.constant 0 : i32
    return %c0_i32, %arg0 : i32, i32
  }
  func.func @transform_1(%arg0: i32) -> (i32, i32) {
    %c0_i32 = arith.constant 0 : i32
    %c0_i32_0 = arith.constant 0 : i32
    %c0_i32_1 = arith.constant 0 : i32
    return %c0_i32, %c0_i32_0 : i32, i32
  }
  func.func @transform_2(%arg0: i32) -> (i32, i32) {
    %c0_i32 = arith.constant 0 : i32
    %c0_i32_0 = arith.constant 0 : i32
    %c0_i32_1 = arith.constant 0 : i32
    return %c0_i32, %c0_i32_0 : i32, i32
  }
  func.func @transform_3(%arg0: i32) -> (i32, i32) {
    %c0_i32 = arith.constant 0 : i32
    %c0_i32_0 = arith.constant 0 : i32
    %c0_i32_1 = arith.constant 0 : i32
    return %c0_i32, %c0_i32_0 : i32, i32
  }
  func.func @transform_4(%arg0: i32) -> (i32, i32) {
    %c0_i32 = arith.constant 0 : i32
    %c0_i32_0 = arith.constant 0 : i32
    %c0_i32_1 = arith.constant 0 : i32
    return %c0_i32, %c0_i32_0 : i32, i32
  }
  func.func @transform_5(%arg0: i32) -> (i32, i32) {
    %c0_i32 = arith.constant 0 : i32
    %c0_i32_0 = arith.constant 0 : i32
    %c0_i32_1 = arith.constant 0 : i32
    return %c0_i32, %c0_i32_0 : i32, i32
  }
  func.func @transform_6(%arg0: i32) -> (i32, i32) {
    %c0_i32 = arith.constant 0 : i32
    %c0_i32_0 = arith.constant 0 : i32
    %c0_i32_1 = arith.constant 0 : i32
    return %c0_i32, %c0_i32_0 : i32, i32
  }
  func.func @transform_7(%arg0: i32) -> (i32, i32) {
    %c0_i32 = arith.constant 0 : i32
    %c0_i32_0 = arith.constant 0 : i32
    return %c0_i32, %arg0 : i32, i32
  }
}

</mosaic_0001>

<bundles_post_ra>
// kernel: tpu_custom_call.1
= control target key start
LH: loop header
LB: loop body
LE: loop exit
PB: predicated region body
PF: predicated region fallthrough
CT: control target
= control target key end

     0   :  { %vm56_vm0 = vcmask 64512   ;;  %v479_v5 = vmov 0   ;;  %s592_s0 = inlined_call_operand.vmem [shape: f32[8,128], index: 0, kind: input, shape index: {}]   ;;  %s593_s1 = inlined_call_operand.vmem [shape: f32[32,8], index: 1, kind: input, shape index: {}]   ;;  %s594_s2 = inlined_call_operand.vmem [shape: f32[32,1], index: 2, kind: input, shape index: {}]   ;;  %s595_s3 = inlined_call_operand.vmem [shape: f32[32,32], index: 3, kind: input, shape index: {}]   ;;  %s596_s4 = inlined_call_operand.vmem [shape: f32[32,1], index: 4, kind: input, shape index: {}]   ;;  %s597_s5 = inlined_call_operand.vmem [shape: f32[4,32], index: 5, kind: input, shape index: {}]   ;;  %s598_s6 = inlined_call_operand.vmem [shape: f32[4,1], index: 6, kind: input, shape index: {}]   ;;  %s599_s7 = inlined_call_operand.hbm [shape: f32[4,128], index: 7, kind: output, shape index: {}]  }
   0x1   :  { %v31_v0 = vld [vmem:[%s592_s0] sm:$0xff]  ;;  %v28_v2 = vld [vmem:[%s593_s1 + $0x8] sm:$0xff]  ;;  %v29_v3 = vld [vmem:[%s593_s1 + $0x10] sm:$0xff]  ;;  %447 = vset.pattern.permute.xlu0 %v479_v5  ;;  %448 = vset.pattern.permute.xlu1 %v479_v5 }
   0x2   :  { %v27_v1 = vld [vmem:[%s593_s1] sm:$0xff]  ;;  %410 = vmatprep.subr.mxu0 %v31_v0  ;;  %v35_v4 = vld [vmem:[%s594_s2 + $0x18] sm:$0xff]  ;;  %v33_v6 = vld [vmem:[%s594_s2 + $0x8] sm:$0xff] }
   0x3   :  { %412 = vmatprep.mubr.msk.f32.mxu0 %vm56_vm0, %v27_v1  ;;  %411 = vmatpush3.msra.mxu0 %v31_v0  ;;  %v30_v7 = vld [vmem:[%s593_s1 + $0x18] sm:$0xff]  ;;  %v34_v8 = vld [vmem:[%s594_s2 + $0x10] sm:$0xff] }
   0x4   :  { %413 = vmatmul.mubr.msk.f32.vlgmr.msra.gmra.mxu0 %vm56_vm0, %v28_v2  ;;  %53 = vperm.xlu0 %447, %v35_v4  }
   0x5   :  { %415 = vmatprep.mubr.msk.f32.mxu0 %vm56_vm0, %v29_v3 }
   0x6   :  { %12 = vsyncpa [#allocation3], 0  ;;  %43 = vperm.xlu1 %448, %v33_v6   ;;  %v32_v9 = vld [vmem:[%s594_s2] sm:$0xff]  ;;  %v165_v10 = vld [vmem:[%s596_s4 + $0x18] sm:$0xff]  ;;  %vm186_vm1 = vcmask 261120   ;;  %v480_v35 = vmov 0.0  }
   0x7   :  { %v164_v11 = vld [vmem:[%s596_s4 + $0x10] sm:$0xff]  ;;  %v163_v12 = vld [vmem:[%s596_s4 + $0x8] sm:$0xff]  ;;  %v162_v13 = vld [vmem:[%s596_s4] sm:$0xff]  ;;  %432 = vmatprep.subr.mxu0 %v480_v35  ;;  %vm481_vm2 = vmmov 0   ;;  %s482_s10 = smov [#allocation2]  }
   0x8   :  { %416 = vmatmul.mubr.msk.f32.gmra.mxu0 %vm56_vm0, %v30_v7  ;;  %48 = vperm.xlu0 %447, %v34_v8   ;;  %v289_v14 = vld [vmem:[%s598_s6] sm:$0xf]  ;;  %v159_v32 = vld [vmem:[%s595_s3 + $0x8] sm:$0xff]  ;;  %v160_v33 = vld [vmem:[%s595_s3 + $0x10] sm:$0xff]  ;;  %s375_s0 = sshll.u32 %s482_s10, 4  ;;  %s376_s0 = int_to_ptr.vmem [resolvable:$true] %s375_s0 }
   0x9   :  { %v158_v15 = vld [vmem:[%s595_s3] sm:$0xff]  ;;  %v161_v34 = vld [vmem:[%s595_s3 + $0x18] sm:$0xff]  ;;  %440 = vmatprep.mubr.msk.f32.mxu0 %vm481_vm2, %v480_v35  ;;  %s457_s11 = scalar_lea.vmem %s376_s0, 64  ;;  %p462_p1 = scmp.lt.s32.totalorder %s376_s0, %s376_s0 }
   0xa   :  { %38 = vperm.xlu1 %448, %v32_v9   ;;  %426 = vmatprep.mubr.msk.f32.mxu1 %vm186_vm1, %v158_v15  ;;  %v288_v52 = vld [vmem:[%s597_s5] sm:$0xf]  ;;  %p458_p0 = scmp.ne.s32.totalorder %s376_s0, %s457_s11  ;;  %p463_p2 = scmp.lt.s32.totalorder %s457_s11, %s457_s11 }
   0xc   :  { %183 = vperm.xlu0 %447, %v165_v10   ;;  %p464_p3 = por %p463_p2, %p462_p1 }
   0xe   :  { %178 = vperm.xlu1 %448, %v164_v11   ;;  %p465_p4 = pnand %p464_p3, %p458_p0 }
  0x10   :  { %173 = vperm.xlu0 %447, %v163_v12  }
  0x12   :  { %168 = vperm.xlu1 %448, %v162_v13  }
  0x14   :  { %292 = vperm.xlu0 %447, %v289_v14  }
  0x7f   :  { %v54_v16 = vpop.permute.xlu0 %53 }
  0x81   :  { %v44_v18 = vpop.permute.xlu1 %43 }
  0x83   :  { %v49_v22 = vpop.permute.xlu0 %48 }
  0x85   :  { %v39_v26 = vpop.permute.xlu1 %38 }
  0x87   :  { %v184_v36 = vpop.permute.xlu0 %183 }
  0x89   :  { %v179_v38 = vpop.permute.xlu1 %178 }
  0x8b   :  { %v174_v42 = vpop.permute.xlu0 %173 }
  0x8d   :  { %v169_v47 = vpop.permute.xlu1 %168 }
  0x8f   :  { %v293_v53 = vpop.permute.xlu0 %292 }
  0xc4   :  { %v414_v17 = vpop.f32.mrf.mxu0 }
  0xc5   :  { %v141_v24 = vadd.f32 %v414_v17, %v44_v18 }
  0xc6   :  { %v135_v19 = vpop.f32.mrf.mxu0 }
  0xc7   :  { %v136_v27 = vadd.f32 %v135_v19, %v39_v26 }
  0xc8   :  { %v417_v20 = vpop.f32.mrf.mxu0 }
  0xc9   :  { %v151_v21 = vadd.f32 %v417_v20, %v54_v16 }
  0xca   :  { %v145_v23 = vpop.f32.mrf.mxu0 }
  0xcb   :  { %449 = vtanh.f32 %v151_v21  ;;  %v146_v25 = vadd.f32 %v145_v23, %v49_v22 }
  0xcd   :  { %451 = vtanh.f32 %v146_v25 }
  0xce   :  { %453 = vtanh.f32 %v141_v24 }
  0xcf   :  { %455 = vtanh.f32 %v136_v27 }
  0xd8   :  { %v450_v28 = vpop.eup %449 }
  0xd9   :  { %418 = vmatprep.subr.mxu1 %v450_v28 }
  0xda   :  { %v452_v29 = vpop.eup %451  ;;  %419 = vmatpush3.msra.mxu1 %v450_v28 }
  0xdb   :  { %420 = vmatprep.subr.mxu1 %v452_v29  ;;  %v454_v30 = vpop.eup %453 }
  0xdc   :  { %421 = vmatpush3.msra.mxu1 %v452_v29  ;;  %v456_v31 = vpop.eup %455 }
  0xdd   :  { %422 = vmatprep.subr.mxu1 %v454_v30 }
  0xde   :  { %423 = vmatpush3.msra.mxu1 %v454_v30 }
  0xdf   :  { %424 = vmatprep.subr.mxu1 %v456_v31 }
  0xe0   :  { %425 = vmatpush3.msra.mxu1 %v456_v31 }
  0xe1   :  { %427 = vmatmul.mubr.msk.f32.vlgmr.msra.gmra.mxu1 %vm186_vm1, %v159_v32 }
  0xe2   :  { %429 = vmatprep.mubr.msk.f32.mxu1 %vm186_vm1, %v160_v33 }
  0xe5   :  { %430 = vmatmul.mubr.msk.f32.gmra.mxu1 %vm186_vm1, %v161_v34 }
 0x1a1   :  { %v428_v37 = vpop.f32.mrf.mxu1 }
 0x1a2   :  { %v271_v44 = vadd.f32 %v428_v37, %v174_v42 }
 0x1a3   :  { %v265_v39 = vpop.f32.mrf.mxu1 }
 0x1a4   :  { %v266_v48 = vadd.f32 %v265_v39, %v169_v47  ;;  %v285_v50 = vmax.f32 %v271_v44, 0.0 }
 0x1a5   :  { %v431_v40 = vpop.f32.mrf.mxu1 }
 0x1a6   :  { %v281_v41 = vadd.f32 %v431_v40, %v184_v36  ;;  %v284_v51 = vmax.f32 %v266_v48, 0.0 }
 0x1a7   :  { %v275_v43 = vpop.f32.mrf.mxu1 }
 0x1a8   :  { %v287_v45 = vmax.f32 %v281_v41, 0.0  ;;  %v276_v46 = vadd.f32 %v275_v43, %v179_v38 }
 0x1aa   :  { %v286_v49 = vmax.f32 %v276_v46, 0.0  ;;  %433 = vmatpush3.msra.mxu0 %v287_v45 }
 0x1ab   :  { %434 = vmatprep.subr.mxu0 %v480_v35 }
 0x1ac   :  { %435 = vmatpush3.msra.mxu0 %v286_v49 }
 0x1ad   :  { %436 = vmatprep.subr.mxu0 %v480_v35 }
 0x1ae   :  { %437 = vmatpush3.msra.mxu0 %v285_v50 }
 0x1af   :  { %438 = vmatprep.subr.mxu0 %v480_v35 }
 0x1b0   :  { %439 = vmatpush3.msra.mxu0 %v284_v51 }
 0x1b1   :  { %441 = vmatmul.mubr.msk.f32.vlgmr.msra.gmra.mxu0 %vm186_vm1, %v288_v52 }
 0x271   :  { %v364_v54 = vpop.f32.mrf.mxu0 }
 0x272   :  { %v365_v55 = vadd.f32 %v364_v54, %v293_v53 }
 0x273   :  { %v442_v56 = vpop.f32.mrf.mxu0 }
 0x274   :  { %368 = vst [vmem:[#allocation2] sm:$0xf] %v365_v55 }
 0x275   :  { %468 = shalt.err (!%p465_p4)
}
 0x276   :  { %378 = dma.vmem_to_hbm [thread:$0]  %s376_s0, 64, %s599_s7, [#allocation3]  }
 0x277   :  { %477 = dma.done.wait [#allocation3], 64  }
 0x278   :  { %478 = vsyncadd [#allocation3], 4294967232 }
 0x279   :  { %382 = vsyncpa [#allocation3], 1 }

</bundles_post_ra>
